<compile_context>
chip_gen: v7x
topology: tpu7x:2x2x1
jax: 0.10.0
libtpu: 0.0.40
codegen_flags: <defaults>
</compile_context>

<pallas_src>
import functools
import math

import jax
import jax.numpy as jnp
from jax.experimental import pallas as pl
from jax.experimental.pallas import tpu as pltpu

ACT_DTYPE = jnp.bfloat16                 # activation dtype between kernels
VMEM_LIMIT_BYTES = 64 * 1024 * 1024      # <= physical VMEM on v5e / v6e / v7x


# ----------------------------------------------------------------------------
# Tiling helpers
# ----------------------------------------------------------------------------
def _round_up(x, m):
    return ((x + m - 1) // m) * m


def _pick_tile_rows(M, target=256):
    """Row (sublane) tile: multiple of 16 (bf16 packing). Prefer a divisor of M so
    no padding is needed; otherwise return the aligned target (caller pads M)."""
    if M <= target:
        return _round_up(M, 16)
    t = (target // 16) * 16
    while t >= 16:
        if M % t == 0:
            return t
        t -= 16
    return (target // 16) * 16


def _pick_tile_cols(N, target=256):
    """Column (lane) tile: a multiple of 128 dividing N, else the full N."""
    if N <= target:
        return N
    t = (target // 128) * 128
    while t >= 128:
        if N % t == 0:
            return t
        t -= 128
    return N


# ----------------------------------------------------------------------------
# Fused (optional LayerNorm) -> matmul -> (+bias) -> (optional GELU) -> (+residual)
# LN result cached in VMEM scratch across the N-tile axis.
# ----------------------------------------------------------------------------
@functools.lru_cache(maxsize=None)
def _make_fused_linear_kernel(has_bias, has_ln, has_res, act, eps):
    def kernel(*refs):
        idx = 0
        x_ref = refs[idx]; idx += 1
        w_ref = refs[idx]; idx += 1
        b_ref = g_ref = bt_ref = r_ref = None
        if has_bias:
            b_ref = refs[idx]; idx += 1
        if has_ln:
            g_ref = refs[idx]; idx += 1
            bt_ref = refs[idx]; idx += 1
        if has_res:
            r_ref = refs[idx]; idx += 1
        o_ref = refs[idx]; idx += 1

        if has_ln:
            xn_ref = refs[idx]  # (tm, K) bf16 scratch: LN(x) reused for all N tiles

            @pl.when(pl.program_id(1) == 0)
            def _():
                xf = x_ref[...].astype(jnp.float32)
                mu = jnp.mean(xf, axis=-1, keepdims=True)
                var = jnp.mean(jnp.square(xf - mu), axis=-1, keepdims=True)
                xf = (xf - mu) * jax.lax.rsqrt(var + eps)
                xf = xf * g_ref[...] + bt_ref[...]
                xn_ref[...] = xf.astype(jnp.bfloat16)

            xm = xn_ref[...]
        else:
            xm = x_ref[...].astype(jnp.bfloat16)

        # bf16 operands, f32 accumulation on the MXU
        y = jnp.dot(xm, w_ref[...].astype(jnp.bfloat16),
                    preferred_element_type=jnp.float32)
        if has_bias:
            y = y + b_ref[...]
        if act == "gelu":
            # TODO(synk): torch F.gelu default is exact erf; tanh approximation used here.
            c = math.sqrt(2.0 / math.pi)
            y = 0.5 * y * (1.0 + jnp.tanh(c * (y + 0.044715 * y * y * y)))
        if has_res:
            y = y + r_ref[...].astype(jnp.float32)
        o_ref[...] = y.astype(o_ref.dtype)

    return kernel


def pallas_fused_linear(x, w, b=None, gamma=None, beta=None, residual=None,
                        act="none", eps=1e-5, out_dtype=ACT_DTYPE,
                        tm_target=256, tn_target=256):
    """y = (opt LN(x)) @ w (+ b) (+ GELU) (+ residual).  x: (..., K), w: (K, N)."""
    lead = x.shape[:-1]
    K = x.shape[-1]
    N = w.shape[-1]
    M = math.prod(lead) if lead else 1
    has_bias = b is not None
    has_ln = gamma is not None
    has_res = residual is not None

    tm = _pick_tile_rows(M, tm_target)
    tn = _pick_tile_cols(N, tn_target)
    Mp = _round_up(M, tm)

    x2 = x.reshape(M, K)
    if Mp != M:
        x2 = jnp.pad(x2, ((0, Mp - M), (0, 0)))

    inputs = [x2, w]
    in_specs = [pl.BlockSpec((tm, K), lambda i, j: (i, 0)),
                pl.BlockSpec((K, tn), lambda i, j: (0, j))]
    if has_bias:
        inputs.append(b.reshape(1, N).astype(jnp.float32))
        in_specs.append(pl.BlockSpec((1, tn), lambda i, j: (0, j)))
    if has_ln:
        inputs += [gamma.reshape(1, K).astype(jnp.float32),
                   beta.reshape(1, K).astype(jnp.float32)]
        in_specs += [pl.BlockSpec((1, K), lambda i, j: (0, 0)),
                     pl.BlockSpec((1, K), lambda i, j: (0, 0))]
    if has_res:
        r2 = residual.reshape(M, N)
        if Mp != M:
            r2 = jnp.pad(r2, ((0, Mp - M), (0, 0)))
        inputs.append(r2)
        in_specs.append(pl.BlockSpec((tm, tn), lambda i, j: (i, j)))

    scratch = [pltpu.VMEM((tm, K), jnp.bfloat16)] if has_ln else []

    out = pl.pallas_call(
        _make_fused_linear_kernel(has_bias, has_ln, has_res, act, eps),
        out_shape=jax.ShapeDtypeStruct((Mp, N), out_dtype),
        grid=(Mp // tm, N // tn),
        in_specs=in_specs,
        out_specs=pl.BlockSpec((tm, tn), lambda i, j: (i, j)),
        scratch_shapes=scratch,
        compiler_params=pltpu.CompilerParams(
            # i parallel (megacore-shardable on v7x); j arbitrary so the LN scratch
            # is reused sequentially across the N tiles of one M tile.
            dimension_semantics=("parallel", "arbitrary"),
            vmem_limit_bytes=VMEM_LIMIT_BYTES),
    )(*inputs)
    if Mp != M:
        out = out[:M]
    return out.reshape(*lead, N)


# ----------------------------------------------------------------------------
# Standalone LayerNorm (final encoder LN) and L2 normalization (F.normalize)
# ----------------------------------------------------------------------------
@functools.lru_cache(maxsize=None)
def _make_layernorm_kernel(eps):
    def kernel(x_ref, g_ref, b_ref, o_ref):
        x = x_ref[...].astype(jnp.float32)
        mu = jnp.mean(x, axis=-1, keepdims=True)
        var = jnp.mean(jnp.square(x - mu), axis=-1, keepdims=True)
        y = (x - mu) * jax.lax.rsqrt(var + eps)
        o_ref[...] = (y * g_ref[...] + b_ref[...]).astype(o_ref.dtype)
    return kernel


def pallas_layernorm(x, g, b, eps=1e-5, out_dtype=ACT_DTYPE):
    lead = x.shape[:-1]
    D = x.shape[-1]
    M = math.prod(lead) if lead else 1
    tm = _pick_tile_rows(M)
    Mp = _round_up(M, tm)
    x2 = x.reshape(M, D)
    if Mp != M:
        x2 = jnp.pad(x2, ((0, Mp - M), (0, 0)))
    out = pl.pallas_call(
        _make_layernorm_kernel(eps),
        out_shape=jax.ShapeDtypeStruct((Mp, D), out_dtype),
        grid=(Mp // tm,),
        in_specs=[pl.BlockSpec((tm, D), lambda i: (i, 0)),
                  pl.BlockSpec((1, D), lambda i: (0, 0)),
                  pl.BlockSpec((1, D), lambda i: (0, 0))],
        out_specs=pl.BlockSpec((tm, D), lambda i: (i, 0)),
        compiler_params=pltpu.CompilerParams(
            dimension_semantics=("parallel",), vmem_limit_bytes=VMEM_LIMIT_BYTES),
    )(x2, g.reshape(1, D).astype(jnp.float32), b.reshape(1, D).astype(jnp.float32))
    if Mp != M:
        out = out[:M]
    return out.reshape(*lead, D)


@functools.lru_cache(maxsize=None)
def _make_l2norm_kernel(eps):
    def kernel(x_ref, o_ref):
        x = x_ref[...].astype(jnp.float32)
        n = jnp.sqrt(jnp.sum(x * x, axis=-1, keepdims=True))
        o_ref[...] = (x / jnp.maximum(n, eps)).astype(o_ref.dtype)
    return kernel


def pallas_l2norm(x, eps=1e-12):
    lead = x.shape[:-1]
    D = x.shape[-1]
    M = math.prod(lead) if lead else 1
    tm = _pick_tile_rows(M)
    Mp = _round_up(M, tm)
    x2 = x.reshape(M, D)
    if Mp != M:
        x2 = jnp.pad(x2, ((0, Mp - M), (0, 0)))
    out = pl.pallas_call(
        _make_l2norm_kernel(eps),
        out_shape=jax.ShapeDtypeStruct((Mp, D), jnp.float32),
        grid=(Mp // tm,),
        in_specs=[pl.BlockSpec((tm, D), lambda i: (i, 0))],
        out_specs=pl.BlockSpec((tm, D), lambda i: (i, 0)),
        compiler_params=pltpu.CompilerParams(
            dimension_semantics=("parallel",), vmem_limit_bytes=VMEM_LIMIT_BYTES),
    )(x2)
    if Mp != M:
        out = out[:M]
    return out.reshape(*lead, D)


# ----------------------------------------------------------------------------
# Attention: reads q/k/v straight from the fused (B, L, 3D) QKV projection, all
# heads processed inside the kernel, output written in (B, L, D) layout.
# Attention scale is pre-folded into the q columns of wqkv (no in-kernel scaling).
# ----------------------------------------------------------------------------
@functools.lru_cache(maxsize=None)
def _make_attention_kernel(num_heads, dh, D):
    def kernel(qkv_ref, bias_ref, o_ref):
        bias = bias_ref[0]                       # (1, L) f32 additive key mask
        outs = []
        for h in range(num_heads):               # unrolled static head loop
            q = qkv_ref[0, :, h * dh:(h + 1) * dh].astype(jnp.bfloat16)
            k = qkv_ref[0, :, D + h * dh:D + (h + 1) * dh].astype(jnp.bfloat16)
            v = qkv_ref[0, :, 2 * D + h * dh:2 * D + (h + 1) * dh].astype(jnp.bfloat16)
            s = jax.lax.dot_general(q, k, (((1,), (1,)), ((), ())),
                                    preferred_element_type=jnp.float32)   # (L, L)
            s = s + bias
            m = jnp.max(s, axis=-1, keepdims=True)
            p = jnp.exp(s - m)
            l = jnp.sum(p, axis=-1, keepdims=True)
            pv = jnp.dot(p.astype(jnp.bfloat16), v,
                         preferred_element_type=jnp.float32)              # (L, dh)
            outs.append(pv * pl.reciprocal(l, approx=True))
        # single lane-dense (L, D) store
        o_ref[0] = jnp.concatenate(outs, axis=-1).astype(o_ref.dtype)
    return kernel


def pallas_attention(qkv, bias, num_heads):
    """qkv: (B, L, 3D) bf16 (scale already folded into q); bias: (B, 1, L) f32."""
    B, L, D3 = qkv.shape
    D = D3 // 3
    dh = D // num_heads
    return pl.pallas_call(
        _make_attention_kernel(num_heads, dh, D),
        out_shape=jax.ShapeDtypeStruct((B, L, D), ACT_DTYPE),
        grid=(B,),
        in_specs=[pl.BlockSpec((1, L, D3), lambda b: (b, 0, 0)),
                  pl.BlockSpec((1, 1, L), lambda b: (b, 0, 0))],
        out_specs=pl.BlockSpec((1, L, D), lambda b: (b, 0, 0)),
        compiler_params=pltpu.CompilerParams(
            dimension_semantics=("parallel",), vmem_limit_bytes=VMEM_LIMIT_BYTES),
    )(qkv, bias)


# ----------------------------------------------------------------------------
# Parameter init (deterministic, synthetic — mirrors the module __init__ shapes)
# Weights feeding the MXU are bf16; LN params / biases stay f32.
# ----------------------------------------------------------------------------
class KeyGen:
    def __init__(self, key):
        self.key = key

    def __call__(self):
        self.key, sub = jax.random.split(self.key)
        return sub


def init_params(key, cfg):
    kg = KeyGen(key)
    D, Fh = cfg["embed_dim"], cfg["ffn_dim"]
    p, C = cfg["patch_size"], cfg["in_chans"]
    n_patches = (cfg["img_size"] // p) ** 2
    scale = (D // cfg["num_heads"]) ** -0.5
    std = 0.02

    def nrm(shape, dtype=jnp.bfloat16):
        return (std * jax.random.normal(kg(), shape, jnp.float32)).astype(dtype)

    params = {
        "patch_w": nrm((C * p * p, D)),                # conv2d(patch) as matmul, bf16
        "patch_b": jnp.zeros((D,), jnp.float32),
        "cls_token": nrm((1, 1, D), jnp.float32),
        "pos_A": nrm((n_patches + 1 + 2, D), jnp.float32),
        "pos_B": nrm((cfg["max_text_len"] + 2, D), jnp.float32),
        "text_embed": nrm((cfg["vocab_size"], D), jnp.float32),
        "vision_head_w": nrm((D, D)),                  # nn.Linear(D, D, bias=False)
        "language_head_w": nrm((D, D)),
        "logit_scale": jnp.array(math.log(1.0 / 0.07), jnp.float32),
        "final_ln": {},
        "layers": [],
    }
    for br in ("A", "B"):
        params["final_ln"][br + "_g"] = jnp.ones((D,), jnp.float32)
        params["final_ln"][br + "_b"] = jnp.zeros((D,), jnp.float32)
    for _ in range(cfg["num_layers"]):
        layer = {}
        for br in ("A", "B"):  # multiway experts: A = vision, B = language
            wq, wk, wv = nrm((D, D)), nrm((D, D)), nrm((D, D))
            layer[br] = {
                "ln1_g": jnp.ones((D,), jnp.float32), "ln1_b": jnp.zeros((D,), jnp.float32),
                # fused QKV projection; attention scale folded into the q columns/bias
                "wqkv": jnp.concatenate([wq * scale, wk, wv], axis=1),
                "bqkv": jnp.zeros((3 * D,), jnp.float32),
                "iln_g": jnp.ones((D,), jnp.float32), "iln_b": jnp.zeros((D,), jnp.float32),
                "wo": nrm((D, D)), "bo": jnp.zeros((D,), jnp.float32),
                "ln2_g": jnp.ones((D,), jnp.float32), "ln2_b": jnp.zeros((D,), jnp.float32),
                "w1": nrm((D, Fh)), "b1": jnp.zeros((Fh,), jnp.float32),
                "ffnln_g": jnp.ones((Fh,), jnp.float32), "ffnln_b": jnp.zeros((Fh,), jnp.float32),
                "w2": nrm((Fh, D)), "b2": jnp.zeros((D,), jnp.float32),
            }
        params["layers"].append(layer)
    return params


# ----------------------------------------------------------------------------
# BEiT3 encoder (pre-LN, sub-LN, multiway) built from the fused Pallas kernels
# ----------------------------------------------------------------------------
def encoder_forward(params, x, branch, attn_bias, num_heads):
    for lp in params["layers"]:
        pr = lp[branch]
        # --- self attention: fused ln1 + QKV projection (one matmul) ---
        residual = x
        qkv = pallas_fused_linear(x, pr["wqkv"], pr["bqkv"],
                                  gamma=pr["ln1_g"], beta=pr["ln1_b"])   # (B, L, 3D)
        a = pallas_attention(qkv, attn_bias, num_heads)                  # (B, L, D)
        # fused inner_attn_ln (subln) + out_proj + residual add
        x = pallas_fused_linear(a, pr["wo"], pr["bo"],
                                gamma=pr["iln_g"], beta=pr["iln_b"],
                                residual=residual)
        # --- FFN: fused ln2 + fc1 + gelu, then fused ffn_layernorm + fc2 + residual ---
        residual = x
        h = pallas_fused_linear(x, pr["w1"], pr["b1"],
                                gamma=pr["ln2_g"], beta=pr["ln2_b"], act="gelu")
        x = pallas_fused_linear(h, pr["w2"], pr["b2"],
                                gamma=pr["ffnln_g"], beta=pr["ffnln_b"],
                                residual=residual)
    # final encoder layernorm (normalize_output)
    x = pallas_layernorm(x, params["final_ln"][branch + "_g"],
                         params["final_ln"][branch + "_b"])
    return x


def _vision_tower(params, image, cfg, return_global, with_head, out_norm):
    B, C, Hh, Ww = image.shape
    p = cfg["patch_size"]
    D = cfg["embed_dim"]
    gh, gw = Hh // p, Ww // p
    # im2col: (B, C, gh, p, gw, p) -> (B, gh*gw, C*p*p), flattened in (c, kh, kw) order
    patches = image.reshape(B, C, gh, p, gw, p).transpose(0, 2, 4, 1, 3, 5)
    patches = patches.reshape(B, gh * gw, C * p * p).astype(ACT_DTYPE)
    tok = pallas_fused_linear(patches, params["patch_w"], params["patch_b"])  # (B, N, D)
    cls = jnp.broadcast_to(params["cls_token"], (B, 1, D)).astype(tok.dtype)
    x = jnp.concatenate([cls, tok], axis=1)
    L0 = x.shape[1]
    x = x + params["pos_A"][2:2 + L0][None]            # positions start at index 2
    # pad the sequence to a multiple of 16 so every downstream kernel tiles cleanly;
    # padded keys are masked out of attention (per-token ops elsewhere are unaffected)
    Lp = _round_up(L0, 16)
    if Lp != L0:
        x = jnp.pad(x, ((0, 0), (0, Lp - L0), (0, 0)))
    key_pad = (jnp.arange(Lp) >= L0).astype(jnp.float32)
    attn_bias = jnp.broadcast_to((key_pad * -1e30)[None, None, :], (B, 1, Lp))
    x = x.astype(ACT_DTYPE)
    x = encoder_forward(params, x, "A", attn_bias, cfg["num_heads"])
    out = x[:, 0, :] if return_global else x[:, :L0, :]
    if with_head:
        out = pallas_fused_linear(out, params["vision_head_w"])          # no bias
    if out_norm:
        out = pallas_l2norm(out)
    return out


def _text_tower(params, text_ids, padding_mask, cfg, return_global, with_head, out_norm):
    B, L0 = text_ids.shape
    x = jnp.take(params["text_embed"], text_ids, axis=0)                 # (B, L, D)
    x = x + params["pos_B"][2:2 + L0][None]
    if padding_mask is None:
        pm = jnp.zeros((B, L0), jnp.float32)
    else:
        pm = padding_mask.astype(jnp.float32)
    x = x * (1.0 - pm[..., None])                                        # zero padded positions
    Lp = _round_up(L0, 16)
    if Lp != L0:
        x = jnp.pad(x, ((0, 0), (0, Lp - L0), (0, 0)))
        pm = jnp.pad(pm, ((0, 0), (0, Lp - L0)), constant_values=1.0)
    attn_bias = (pm * -1e30)[:, None, :]                                 # (B, 1, Lp) key mask
    x = x.astype(ACT_DTYPE)
    x = encoder_forward(params, x, "B", attn_bias, cfg["num_heads"])
    out = x[:, 0, :] if return_global else x[:, :L0, :]
    if with_head:
        out = pallas_fused_linear(out, params["language_head_w"])        # no bias
    if out_norm:
        out = pallas_l2norm(out)
    return out


def musk_forward(params, cfg, image=None, text_description=None, padding_mask=None,
                 return_global=True, with_head=True, out_norm=True):
    vision_cls = None
    language_cls = None
    if image is not None:
        vision_cls = _vision_tower(params, image, cfg, return_global, with_head, out_norm)
    if text_description is not None:
        language_cls = _text_tower(params, text_description, padding_mask, cfg,
                                   return_global, with_head, out_norm)
    return vision_cls, language_cls


# ----------------------------------------------------------------------------
# Demo
# ----------------------------------------------------------------------------
if __name__ == "__main__":
    cfg = dict(
        embed_dim=64,
        num_heads=4,
        ffn_dim=128,
        num_layers=2,
        img_size=16,
        patch_size=4,
        in_chans=3,
        vocab_size=64,
        max_text_len=16,
    )
    key = jax.random.PRNGKey(0)
    kp, ki, kt = jax.random.split(key, 3)
    params = init_params(kp, cfg)

    B = 2
    image = jax.random.normal(ki, (B, cfg["in_chans"], cfg["img_size"], cfg["img_size"]),
                              jnp.float32)
    text = jax.random.randint(kt, (B, 8), 0, cfg["vocab_size"])
    padding_mask = jnp.array([[0, 0, 0, 0, 0, 0, 0, 0],
                              [0, 0, 0, 0, 0, 1, 1, 1]], dtype=jnp.int32)

    vision_cls, language_cls = musk_forward(params, cfg, image=image,
                                            text_description=text,
                                            padding_mask=padding_mask)
    (vision_cls, language_cls) = jax.block_until_ready((vision_cls, language_cls))

    assert vision_cls.shape == (B, cfg["embed_dim"])
    assert language_cls.shape == (B, cfg["embed_dim"])
    assert bool(jnp.all(jnp.isfinite(vision_cls))) and bool(jnp.all(jnp.isfinite(language_cls)))
    # F.normalize semantics: unit-norm outputs
    assert bool(jnp.allclose(jnp.linalg.norm(vision_cls, axis=-1), 1.0, atol=1e-3))
    assert bool(jnp.allclose(jnp.linalg.norm(language_cls, axis=-1), 1.0, atol=1e-3))
    print("KERNEL_OK")
</pallas_src>

<mosaic_0001>
module attributes {stable_mosaic.version = 11 : i64} {
  func.func @kernel(%arg0: i32, %arg1: i32, %arg2: memref<32x48xbf16, #tpu.memory_space<vmem>>, %arg3: memref<48x64xbf16, #tpu.memory_space<vmem>>, %arg4: memref<1x64xf32, #tpu.memory_space<vmem>>, %arg5: memref<32x64xbf16, #tpu.memory_space<vmem>>) attributes {dimension_semantics = [#tpu.dimension_semantics<parallel>, #tpu.dimension_semantics<arbitrary>], iteration_bounds = array<i64: 1, 1>, scalar_prefetch = 0 : i64, scratch_operands = 0 : i64, tpu.core_type = #tpu.core_type<tc>, window_params = [{transform_indices = @transform_0, window_bounds = array<i64: 32, 48>}, {transform_indices = @transform_1, window_bounds = array<i64: 48, 64>}, {transform_indices = @transform_2, window_bounds = array<i64: 1, 64>}, {transform_indices = @transform_3, window_bounds = array<i64: 32, 64>}]} {
    %c0 = arith.constant 0 : index
    %c0_0 = arith.constant 0 : index
    %0 = vector.load %arg2[%c0, %c0_0] : memref<32x48xbf16, #tpu.memory_space<vmem>>, vector<32x48xbf16>
    %c0_1 = arith.constant 0 : index
    %c0_2 = arith.constant 0 : index
    %1 = vector.load %arg3[%c0_1, %c0_2] : memref<48x64xbf16, #tpu.memory_space<vmem>>, vector<48x64xbf16>
    %cst = arith.constant dense<0.000000e+00> : vector<32x64xf32>
    %2 = tpu.matmul %0, %1, %cst {dimension_numbers = #tpu.dot_dimension_numbers<[1], [0], [0], [1], [0, 0, 1, 1], [], []>} : vector<32x48xbf16>, vector<48x64xbf16>, vector<32x64xf32> -> vector<32x64xf32>
    %c0_3 = arith.constant 0 : index
    %c0_4 = arith.constant 0 : index
    %3 = vector.load %arg4[%c0_3, %c0_4] : memref<1x64xf32, #tpu.memory_space<vmem>>, vector<1x64xf32>
    %4 = vector.broadcast %3 : vector<1x64xf32> to vector<32x64xf32>
    %5 = arith.addf %2, %4 : vector<32x64xf32>
    %6 = arith.truncf %5 : vector<32x64xf32> to vector<32x64xbf16>
    %c0_5 = arith.constant 0 : index
    %c0_6 = arith.constant 0 : index
    %7 = vector.load %arg5[%c0_5, %c0_6] : memref<32x64xbf16, #tpu.memory_space<vmem>>, vector<32x64xbf16>
    tpu.vector_store %arg5[%c0_5, %c0_6], %6 {strides = array<i32>} : memref<32x64xbf16, #tpu.memory_space<vmem>>, vector<32x64xbf16>,
    return
  }
  func.func @transform_0(%arg0: i32, %arg1: i32) -> (i32, i32) {
    %c0_i32 = arith.constant 0 : i32
    %c0_i32_0 = arith.constant 0 : i32
    return %arg0, %c0_i32 : i32, i32
  }
  func.func @transform_1(%arg0: i32, %arg1: i32) -> (i32, i32) {
    %c0_i32 = arith.constant 0 : i32
    %c0_i32_0 = arith.constant 0 : i32
    return %c0_i32, %arg1 : i32, i32
  }
  func.func @transform_2(%arg0: i32, %arg1: i32) -> (i32, i32) {
    %c0_i32 = arith.constant 0 : i32
    %c0_i32_0 = arith.constant 0 : i32
    return %c0_i32, %arg1 : i32, i32
  }
  func.func @transform_3(%arg0: i32, %arg1: i32) -> (i32, i32) {
    %c0_i32 = arith.constant 0 : i32
    return %arg0, %arg1 : i32, i32
  }
}

</mosaic_0001>

<bundles_post_ra>
// kernel: tpu_custom_call.1
= control target key start
LH: loop header
LB: loop body
LE: loop exit
PB: predicated region body
PF: predicated region fallthrough
CT: control target
= control target key end

     0   :  { %8 = vsyncpa [#allocation3], 0  ;;  %s425_s0 = inlined_call_operand.hbm [shape: bf16[32,48], index: 0, kind: input, shape index: {}]   ;;  %s426_s1 = inlined_call_operand.hbm [shape: bf16[48,64], index: 1, kind: input, shape index: {}]   ;;  %s427_s2 = inlined_call_operand.hbm [shape: f32[1,64], index: 2, kind: input, shape index: {}]   ;;  %s428_s3 = inlined_call_operand.hbm [shape: bf16[32,64], index: 3, kind: output, shape index: {}]  }
   0x1   :  { %9 = vsyncpa [#allocation6], 0 }
   0x2   :  { %10 = vsyncpa [#allocation4], 0  ;;  %s331_s12 = smov [#allocation5]   ;;  %s332_s14 = smov [#allocation2]  }
   0x3   :  { %s28_s13 = sshll.u32 %s331_s12, 4  ;;  %s16_s15 = sshll.u32 %s332_s14, 4  ;;  %s29_s13 = int_to_ptr.vmem [resolvable:$true] %s28_s13  ;;  %s357_s15 = int_to_ptr.vmem [resolvable:$true] %s16_s15 }
   0x4   :  { %s237_s18 = scalar_lea.hbm %s426_s1, 384 }
   0x5   :  { %p238_p0 = scmp.ne.s32.totalorder %s426_s1, %s237_s18  ;;  %p241_p1 = scmp.lt.u32.totalorder %s237_s18, %s426_s1 }
   0x7   :  { %p243_p2 = pnand %p241_p1, %p238_p0 }
   0x9   :  { %246 = shalt.err (!%p243_p2)
}
   0xa   :  { %s247_s23 = scalar_lea.vmem %s29_s13, 384  ;;  %p252_p4 = scmp.lt.s32.totalorder %s29_s13, %s29_s13 }
   0xb   :  { %p248_p3 = scmp.ne.s32.totalorder %s29_s13, %s247_s23  ;;  %p253_p5 = scmp.lt.s32.totalorder %s247_s23, %s247_s23 }
   0xd   :  { %p254_p6 = por %p253_p5, %p252_p4 }
   0xf   :  { %p255_p7 = pnand %p254_p6, %p248_p3 }
  0x11   :  { %258 = shalt.err (!%p255_p7)
}
  0x12   :  { %s333_s24 = smov 64   ;;  %s334_s25 = smov 4  }
  0x13   :  { %34 = dma.hbm_to_vmem [thread:$0]  %s426_s1, 384, %s29_s13, [#allocation6], %s333_s24, %s333_s24, %s334_s25  }
  0x14   :  { %s259_s30 = scalar_lea.hbm %s425_s0, 256 }
  0x15   :  { %p260_p8 = scmp.ne.s32.totalorder %s425_s0, %s259_s30  ;;  %p263_p9 = scmp.lt.u32.totalorder %s259_s30, %s425_s0 }
  0x17   :  { %p265_p10 = pnand %p263_p9, %p260_p8 }
  0x19   :  { %268 = shalt.err (!%p265_p10)
}
  0x1a   :  { %s269_s8 = scalar_lea.vmem %s357_s15, 256  ;;  %p274_p12 = scmp.lt.s32.totalorder %s357_s15, %s357_s15 }
  0x1b   :  { %p270_p11 = scmp.ne.s32.totalorder %s357_s15, %s269_s8  ;;  %p275_p13 = scmp.lt.s32.totalorder %s269_s8, %s269_s8 }
  0x1d   :  { %p276_p0 = por %p275_p13, %p274_p12 }
  0x1f   :  { %p277_p1 = pnand %p276_p0, %p270_p11 }
  0x21   :  { %280 = shalt.err (!%p277_p1)
}
  0x22   :  { %22 = dma.hbm_to_vmem [thread:$0]  %s425_s0, 256, %s357_s15, [#allocation3], %s333_s24, %s333_s24, %s334_s25  }
  0x23   :  { %s335_s10 = smov [#allocation7]   ;;  %s281_s14 = scalar_lea.hbm %s427_s2, 16 }
  0x24   :  { %s41_s11 = sshll.u32 %s335_s10, 4  ;;  %p282_p2 = scmp.ne.s32.totalorder %s427_s2, %s281_s14  ;;  %s42_s11 = int_to_ptr.vmem [resolvable:$true] %s41_s11 }
  0x25   :  { %p285_p3 = scmp.lt.u32.totalorder %s281_s14, %s427_s2 }
  0x27   :  { %p287_p4 = pnand %p285_p3, %p282_p2 }
  0x29   :  { %290 = shalt.err (!%p287_p4)
}
  0x2a   :  { %s291_s20 = scalar_lea.vmem %s42_s11, 16  ;;  %s295_s0 = scalar_lea.vmem %s42_s11, 32 }
  0x2b   :  { %p292_p5 = scmp.ne.s32.totalorder %s42_s11, %s291_s20  ;;  %p296_p6 = scmp.lt.s32.totalorder %s42_s11, %s42_s11 }
  0x2c   :  { %p297_p7 = scmp.lt.s32.totalorder %s295_s0, %s291_s20 }
  0x2e   :  { %p298_p8 = por %p297_p7, %p296_p6 }
  0x30   :  { %p299_p9 = pnand %p298_p8, %p292_p5 }
  0x32   :  { %302 = shalt.err (!%p299_p9)
}
  0x33   :  { %44 = dma.hbm_to_vmem [thread:$0]  %s427_s2, 16, %s42_s11, [#allocation6]  }
  0x34   :  { %325 = dma.done.wait [#allocation3], 256  }
  0x35   :  { %326 = vsyncadd [#allocation3], 4294967040 }
  0x36   :  { %327 = dma.done.wait [#allocation6], 400  }
  0x37   :  { %328 = vsyncadd [#allocation6], 4294966896  ;;  %v232_v0 = vld [vmem:[#allocation5] sm:$0xff]   ;;  %v233_v1 = vld [vmem:[#allocation5 + $0x8] sm:$0xff]   ;;  %vm100_vm0 = vcmask 392192   ;;  %vm172_vm1 = vcmask 519168  }
  0x38   :  { %216 = vmatprep.subr.bf16.mxu0 %v232_v0  ;;  %v235_v2 = vld [vmem:[#allocation2] sm:$0xff]   ;;  %v236_v4 = vld [vmem:[#allocation2 + $0x8] sm:$0xff]   ;;  %s336_s2 = smov [#allocation8]  }
  0x39   :  { %217 = vmatpush3.bf16.msra.mxu0 %v232_v0  ;;  %v234_v3 = vld [vmem:[#allocation5 + $0x10] sm:$0xff]   ;;  %222 = vmatprep.mubr.msk.bf16.mxu0 %vm100_vm0, %v235_v2  ;;  %v195_v5 = vld [vmem:[#allocation7] ss:$0 sm:$0xff]  ;;  %s182_s22 = sshll.u32 %s336_s2, 4  ;;  %s183_s22 = int_to_ptr.vmem [resolvable:$true] %s182_s22 }
  0x3a   :  { %218 = vmatprep.subr.bf16.mxu0 %v233_v1  ;;  %s303_s23 = scalar_lea.vmem %s183_s22, 256  ;;  %p308_p11 = scmp.lt.s32.totalorder %s183_s22, %s183_s22 }
  0x3b   :  { %p304_p10 = scmp.ne.s32.totalorder %s183_s22, %s303_s23  ;;  %p309_p12 = scmp.lt.s32.totalorder %s303_s23, %s303_s23 }
  0x3d   :  { %219 = vmatpush3.bf16.msra.mxu0 %v233_v1  ;;  %p310_p13 = por %p309_p12, %p308_p11 }
  0x3e   :  { %220 = vmatprep.subr.bf16.mxu0 %v234_v3 }
  0x3f   :  { %p311_p0 = pnand %p310_p13, %p304_p10 }
  0x41   :  { %221 = vmatpush3.bf16.msra.mxu0 %v234_v3 }
  0x44   :  { %223 = vmatmul.mubr.msk.bf16.vlgmr.msra.gmra.mrb[0].mxu0 %vm100_vm0, %v236_v4 }
 0x117   :  { %v224_v6 = vpop.f32.mrb[0].mxu0 }
 0x118   :  { %v150_v7 = vadd.f32 %v224_v6, %v195_v5  ;;  %v141_v8 = vpop.f32.mrb[1].mxu0 }
 0x119   :  { %v142_v9 = vadd.f32 %v195_v5, %v141_v8  ;;  %v225_v10 = vpop.f32.mrb[2].mxu0 }
 0x11a   :  { %v209_v11 = vpack.c.bf16 %v150_v7, %v150_v7  ;;  %v153_v12 = vadd.f32 %v225_v10, %v195_v5  ;;  %v144_v13 = vpop.f32.mrb[3].mxu0 }
 0x11b   :  { %v207_v14 = vpack.c.bf16 %v142_v9, %v142_v9  ;;  %v145_v15 = vadd.f32 %v195_v5, %v144_v13 }
 0x11c   :  { %175 = vst.msk [vmem:[#allocation8 + $0x8] sm:$0xf] %vm172_vm1, %v209_v11  ;;  %v210_v16 = vpack.c.bf16 %v153_v12, %v153_v12 }
 0x11d   :  { %173 = vst.msk [vmem:[#allocation8] sm:$0xf] %vm172_vm1, %v207_v14  ;;  %v208_v17 = vpack.c.bf16 %v145_v15, %v145_v15 }
 0x11e   :  { %176 = vst.msk [vmem:[#allocation8 + $0xc] sm:$0xf] %vm172_vm1, %v210_v16 }
 0x11f   :  { %174 = vst.msk [vmem:[#allocation8 + $0x4] sm:$0xf] %vm172_vm1, %v208_v17 }
 0x120   :  { %314 = shalt.err (!%p311_p0)
}
 0x121   :  { %s315_s28 = scalar_lea.hbm %s428_s3, 256 }
 0x122   :  { %p316_p1 = scmp.ne.s32.totalorder %s428_s3, %s315_s28  ;;  %p319_p2 = scmp.lt.u32.totalorder %s315_s28, %s428_s3 }
 0x124   :  { %p321_p3 = pnand %p319_p2, %p316_p1 }
 0x126   :  { %324 = shalt.err (!%p321_p3)
}
 0x127   :  { %188 = dma.vmem_to_hbm [thread:$0]  %s183_s22, 256, %s428_s3, [#allocation4], %s333_s24, %s333_s24, %s334_s25  }
 0x128   :  { %329 = dma.done.wait [#allocation4], 256  }
 0x129   :  { %330 = vsyncadd [#allocation4], 4294967040 }
 0x12a   :  { %192 = vsyncpa [#allocation3], 1 }
 0x12b   :  { %193 = vsyncpa [#allocation6], 1 }
 0x12c   :  { %194 = vsyncpa [#allocation4], 1 }

</bundles_post_ra>
